<compile_context>
chip_gen: v6e
topology: v6e:2x2x1
jax: 0.10.0
libtpu: 0.0.40
codegen_flags: <defaults>
</compile_context>

<pallas_src>
import functools

import jax
import jax.numpy as jnp
from jax.experimental import pallas as pl
from jax.experimental.pallas import tpu as pltpu

_LANES = 128
_SUBLANES = 8
_EPS = 1e-5

_ONE_PASS_MAX_COLS = 512          # feature-stripe cap for the one-pass plan
_ONE_PASS_BUDGET_FRACTION = 0.70  # fraction of physical VMEM usable for blocks
_FB_DEFAULT_ROW_BLOCK = 2048      # default row tile for the two-pass fallback
_FB_MAX_FEATURE_COLS = 2048       # feature-stripe cap for the two-pass fallback


def _round_up(a, b):
    return (a + b - 1) // b * b


def _is_narrow_float(dtype):
    return jnp.issubdtype(dtype, jnp.floating) and jnp.dtype(dtype).itemsize < 4


def _vmem_capacity_bytes():
    """Physical VMEM per core (128 MiB v5e/v6e, 64 MiB v7x); safe fallback."""
    try:
        info = pltpu.get_tpu_info()
        cap = getattr(info, "vmem_capacity_bytes", None)
        if cap:
            return int(cap)
    except Exception:
        pass
    return 64 << 20  # conservative default (v7x-sized)


def _compiler_params(vmem_need, semantics, vmem_capacity):
    # Cover the double-buffered I/O blocks *and* the in-kernel temporaries,
    # with headroom for compiler-internal scratch, capped below physical VMEM.
    limit = max(int(vmem_need) + (16 << 20), 48 << 20)
    limit = min(limit, int(vmem_capacity * 0.90))
    return pltpu.CompilerParams(
        dimension_semantics=semantics,
        vmem_limit_bytes=int(limit),
    )


# ----------------------------------------------------------------------------
# Primary path: one feature stripe per grid step, ALL rows resident.
# ----------------------------------------------------------------------------
def _one_pass_bytes(n, d_tile, itemsize):
    """VMEM estimate: double-buffered in/out blocks + elementwise temporaries."""
    tmp_unit = 4 if itemsize >= 4 else itemsize
    io = 4 * n * d_tile * itemsize        # (in + out) x double buffering
    tmp = 3 * n * d_tile * tmp_unit       # diff / diff^2 / epilogue intermediates
    return io + tmp + (1 << 20)


def _one_pass_feature_tile(n, d, itemsize, budget):
    """Feature-stripe width for the one-pass plan, or 0 if it can't fit VMEM."""
    if d % _LANES != 0:
        # Ragged feature dim: full-extent column block (no padding, no slice).
        return d if _one_pass_bytes(n, d, itemsize) <= budget else 0
    cands = [dt for dt in range(min(d, _ONE_PASS_MAX_COLS), 0, -_LANES)
             if d % dt == 0]
    feas = [dt for dt in cands if _one_pass_bytes(n, dt, itemsize) <= budget]
    if not feas:
        return 0
    # Prefer >=4 (else >=2) stripes so the "parallel" axis can shard across
    # v7x's two TensorCores and BlockSpec pipelining has something to overlap.
    for min_stripes in (4, 2):
        for dt in feas:
            if d // dt >= min_stripes:
                return dt
    return feas[0]


def _seqbn_one_pass_kernel(x_ref, gamma_ref, beta_ref, o_ref, *, inv_n, eps):
    x = x_ref[...]                          # (rows, d_tile) — no padded rows/cols
    rows = x.shape[0]

    if _is_narrow_float(x.dtype):
        # Row-axis sums on the (otherwise idle) MXU with f32 accumulation;
        # temporaries stay in the narrow dtype (no full-block f32 copy).
        ones = jnp.ones((_SUBLANES, rows), dtype=x.dtype)
        mean = jnp.dot(ones, x, preferred_element_type=jnp.float32)[0:1] * inv_n
        diff = x - mean.astype(x.dtype)
        m2 = jnp.dot(ones, diff * diff, preferred_element_type=jnp.float32)[0:1]
    else:
        # f32 path: exact f32 VPU accumulation; centered sum avoids the
        # E[x^2] - mean^2 cancellation.  (x.astype(f32) is a no-op for f32.)
        xf = x.astype(jnp.float32)
        mean = jnp.sum(xf, axis=0, keepdims=True) * inv_n
        diff = xf - mean
        m2 = jnp.sum(diff * diff, axis=0, keepdims=True)

    var = m2 * inv_n                        # biased variance (training mode)
    inv_std = jax.lax.rsqrt(var + eps)
    scale = gamma_ref[...] * inv_std        # (1, d_tile) f32
    shift = beta_ref[...] - mean * scale

    # Folded affine recomputed straight from x_ref (no reuse of long-lived temps).
    if _is_narrow_float(x.dtype):
        o_ref[...] = (x * scale.astype(x.dtype)
                      + shift.astype(x.dtype)).astype(o_ref.dtype)
    else:
        o_ref[...] = (x.astype(jnp.float32) * scale + shift).astype(o_ref.dtype)


def _seq_bn_one_pass(flat, gamma2d, beta2d, n, d, d_tile, eps, vmem_cap):
    itemsize = jnp.dtype(flat.dtype).itemsize
    need = _one_pass_bytes(n, d_tile, itemsize)
    return pl.pallas_call(
        functools.partial(_seqbn_one_pass_kernel, inv_n=1.0 / n, eps=eps),
        out_shape=jax.ShapeDtypeStruct((n, d), flat.dtype),
        grid=(d // d_tile,),
        in_specs=[
            pl.BlockSpec((n, d_tile), lambda j: (0, j)),
            pl.BlockSpec((1, d_tile), lambda j: (0, j)),
            pl.BlockSpec((1, d_tile), lambda j: (0, j)),
        ],
        out_specs=pl.BlockSpec((n, d_tile), lambda j: (0, j)),
        compiler_params=_compiler_params(need, ("parallel",), vmem_cap),
    )(flat, gamma2d, beta2d)


# ----------------------------------------------------------------------------
# Fallback path (large N): pass 1 = row-tiled Welford stats, pass 2 = affine.
# ----------------------------------------------------------------------------
def _feature_divisors(d, cap):
    return [dt for dt in range(min(d, cap), 0, -_LANES) if d % dt == 0]


def _two_pass_tiles(n, d, itemsize, budget, user_row_block):
    tmp_unit = 4 if itemsize >= 4 else itemsize
    per_elem = 4 * itemsize + 2 * tmp_unit   # dbl-buffered in+out + temporaries

    if d % _LANES == 0:
        # Prefer full-row blocks (fully contiguous HBM DMA), else 128-mult stripes.
        cands = [d] + [dt for dt in _feature_divisors(d, _FB_MAX_FEATURE_COLS)
                       if dt != d]
    else:
        cands = [d]                          # ragged d: full-extent column block

    d_tile = cands[-1]
    for cand in cands:
        if budget // (per_elem * cand) >= 512:
            d_tile = cand
            break

    rb_cap = max(_SUBLANES,
                 (budget // (per_elem * d_tile)) // _SUBLANES * _SUBLANES)
    n_cap = _round_up(n, _SUBLANES)
    if user_row_block is not None:
        rb = min(rb_cap, n_cap,
                 max(_SUBLANES, _round_up(int(user_row_block), _SUBLANES)))
    else:
        rb = min(rb_cap, _FB_DEFAULT_ROW_BLOCK, n_cap)
        if n % rb != 0:
            # Prefer a row block dividing n: no ragged tile -> no masking cost.
            r = rb
            while r >= max(_SUBLANES, rb // 2):
                if n % r == 0:
                    rb = r
                    break
                r -= _SUBLANES
    return d_tile, rb


def _seqbn_stats_kernel(x_ref, gamma_ref, beta_ref, scale_ref, shift_ref,
                        mean_acc, m2_acc, *, n_valid, eps, ragged):
    ri = pl.program_id(1)
    tn = x_ref.shape[0]
    x = x_ref[...]
    narrow = _is_narrow_float(x.dtype)

    if ragged:
        # Only the last row tile can be partial (cdiv grid); OOB block contents
        # are unspecified, so mask them out with selects.
        row0 = ri * tn
        valid = (row0 + jax.lax.broadcasted_iota(jnp.int32, (tn, 1), 0)) < n_valid
        cnt_b = jnp.maximum(jnp.minimum(tn, n_valid - row0), 1).astype(jnp.float32)
    else:
        valid = None
        cnt_b = jnp.float32(tn)

    if narrow:
        zero = jnp.zeros((), x.dtype)
        xm = jnp.where(valid, x, zero) if ragged else x
        ones = jnp.ones((_SUBLANES, tn), dtype=x.dtype)
        mean_b = jnp.dot(ones, xm, preferred_element_type=jnp.float32)[0:1] / cnt_b
        diff_b = xm - mean_b.astype(x.dtype)
        if ragged:
            diff_b = jnp.where(valid, diff_b, zero)
        m2_b = jnp.dot(ones, diff_b * diff_b,
                       preferred_element_type=jnp.float32)[0:1]
    else:
        xf = x.astype(jnp.float32)
        xm = jnp.where(valid, xf, 0.0) if ragged else xf
        mean_b = jnp.sum(xm, axis=0, keepdims=True) / cnt_b
        diff_b = xm - mean_b
        if ragged:
            diff_b = jnp.where(valid, diff_b, 0.0)
        m2_b = jnp.sum(diff_b * diff_b, axis=0, keepdims=True)

    @pl.when(ri == 0)
    def _():
        mean_acc[...] = mean_b
        m2_acc[...] = m2_b

    @pl.when(ri > 0)
    def _():
        # Chan/Welford combine.  All previous row tiles are full (only the last
        # tile of the cdiv grid can be partial), so n_a = ri * tn exactly.
        n_a = (ri * tn).astype(jnp.float32)
        n_t = n_a + cnt_b
        delta = mean_b - mean_acc[...]
        mean_acc[...] = mean_acc[...] + delta * (cnt_b / n_t)
        m2_acc[...] = m2_acc[...] + m2_b + (delta * delta) * (n_a * cnt_b / n_t)

    @pl.when(ri == pl.num_programs(1) - 1)
    def _():
        var = m2_acc[...] * (1.0 / n_valid)      # biased variance (training mode)
        inv_std = jax.lax.rsqrt(var + eps)
        scale = gamma_ref[...] * inv_std
        scale_ref[...] = scale
        shift_ref[...] = beta_ref[...] - mean_acc[...] * scale


def _seqbn_affine_kernel(x_ref, scale_ref, shift_ref, o_ref):
    x = x_ref[...]
    if _is_narrow_float(x.dtype):
        o_ref[...] = (x * scale_ref[...].astype(x.dtype)
                      + shift_ref[...].astype(x.dtype)).astype(o_ref.dtype)
    else:
        o_ref[...] = (x.astype(jnp.float32) * scale_ref[...]
                      + shift_ref[...]).astype(o_ref.dtype)


def _seq_bn_two_pass(flat, gamma2d, beta2d, n, d, eps, user_row_block,
                     budget, vmem_cap):
    itemsize = jnp.dtype(flat.dtype).itemsize
    tmp_unit = 4 if itemsize >= 4 else itemsize
    d_tile, rb = _two_pass_tiles(n, d, itemsize, budget, user_row_block)
    ragged = (n % rb) != 0
    grid = (d // d_tile, pl.cdiv(n, rb))

    blk = rb * d_tile
    stats_need = 2 * blk * itemsize + 3 * blk * tmp_unit + (2 << 20)
    aff_need = 4 * blk * itemsize + 2 * blk * tmp_unit + (2 << 20)

    # Pass 1: per-feature scale/shift from Welford-combined batch statistics.
    scale, shift = pl.pallas_call(
        functools.partial(_seqbn_stats_kernel, n_valid=n, eps=eps, ragged=ragged),
        out_shape=(jax.ShapeDtypeStruct((1, d), jnp.float32),
                   jax.ShapeDtypeStruct((1, d), jnp.float32)),
        grid=grid,
        in_specs=[
            pl.BlockSpec((rb, d_tile), lambda j, i: (i, j)),
            pl.BlockSpec((1, d_tile), lambda j, i: (0, j)),
            pl.BlockSpec((1, d_tile), lambda j, i: (0, j)),
        ],
        out_specs=(
            pl.BlockSpec((1, d_tile), lambda j, i: (0, j)),
            pl.BlockSpec((1, d_tile), lambda j, i: (0, j)),
        ),
        scratch_shapes=[pltpu.VMEM((1, d_tile), jnp.float32),
                        pltpu.VMEM((1, d_tile), jnp.float32)],
        compiler_params=_compiler_params(stats_need, ("parallel", "arbitrary"),
                                         vmem_cap),
    )(flat, gamma2d, beta2d)

    # Pass 2: streaming y = x * scale + shift.
    # NOTE: no input_output_aliases — `flat` is the caller's (non-donated)
    # activation, so aliasing would just make XLA insert a defensive copy.
    out = pl.pallas_call(
        _seqbn_affine_kernel,
        out_shape=jax.ShapeDtypeStruct((n, d), flat.dtype),
        grid=grid,
        in_specs=[
            pl.BlockSpec((rb, d_tile), lambda j, i: (i, j)),
            pl.BlockSpec((1, d_tile), lambda j, i: (0, j)),
            pl.BlockSpec((1, d_tile), lambda j, i: (0, j)),
        ],
        out_specs=pl.BlockSpec((rb, d_tile), lambda j, i: (i, j)),
        compiler_params=_compiler_params(aff_need, ("parallel", "parallel"),
                                         vmem_cap),
    )(flat, scale, shift)
    return out


# ----------------------------------------------------------------------------
# Public wrapper (SeqBN.forward equivalent)
# ----------------------------------------------------------------------------
def seq_bn(x, gamma, beta, *, eps=_EPS, force_two_pass=False, row_block=None):
    """Training-mode BatchNorm1d over the last dim of x (SeqBN.forward)."""
    d = x.shape[-1]
    assert gamma.shape == (d,) and beta.shape == (d,)

    flat = x.reshape(-1, d)
    n = flat.shape[0]
    itemsize = jnp.dtype(x.dtype).itemsize

    gamma2d = gamma.astype(jnp.float32).reshape(1, d)
    beta2d = beta.astype(jnp.float32).reshape(1, d)

    vmem_cap = _vmem_capacity_bytes()
    budget = int(vmem_cap * _ONE_PASS_BUDGET_FRACTION)

    d_tile = 0 if force_two_pass else _one_pass_feature_tile(n, d, itemsize, budget)
    if d_tile:
        out = _seq_bn_one_pass(flat, gamma2d, beta2d, n, d, d_tile, eps, vmem_cap)
    else:
        out = _seq_bn_two_pass(flat, gamma2d, beta2d, n, d, eps, row_block,
                               budget, vmem_cap)
    return out.reshape(x.shape)


def _reference(x, gamma, beta, eps=_EPS):
    d = x.shape[-1]
    flat = x.reshape(-1, d).astype(jnp.float32)
    mean = flat.mean(axis=0, keepdims=True)
    var = ((flat - mean) ** 2).mean(axis=0, keepdims=True)
    y = (flat - mean) / jnp.sqrt(var + eps) * gamma + beta
    return y.reshape(x.shape).astype(x.dtype)


if __name__ == "__main__":
    key = jax.random.PRNGKey(0)
    ks = jax.random.split(key, 12)

    def check(x, gamma, beta, atol, **kw):
        y = jax.block_until_ready(seq_bn(x, gamma, beta, **kw))
        ref = _reference(x, gamma, beta)
        assert y.shape == x.shape and y.dtype == x.dtype
        err = float(jnp.max(jnp.abs(y.astype(jnp.float32) - ref.astype(jnp.float32))))
        assert err <= atol, err

    # 1) one-pass, ragged feature dim (full-extent column block, zero-copy)
    x = jax.random.normal(ks[0], (2, 8, 32), jnp.float32)
    g = 1.0 + 0.1 * jax.random.normal(ks[1], (32,), jnp.float32)
    b = 0.1 * jax.random.normal(ks[2], (32,), jnp.float32)
    check(x, g, b, 1e-4)

    # 2) one-pass, 128-aligned fast path (no pad/slice, multi-stripe grid)
    x = jax.random.normal(ks[3], (4, 16, 256), jnp.float32)
    g = 1.0 + 0.1 * jax.random.normal(ks[4], (256,), jnp.float32)
    b = 0.1 * jax.random.normal(ks[5], (256,), jnp.float32)
    check(x, g, b, 1e-4)

    # 3) forced two-pass (Welford combine) with ragged rows and ragged features
    x = jax.random.normal(ks[6], (4, 60, 48), jnp.float32)
    g = 1.0 + 0.1 * jax.random.normal(ks[7], (48,), jnp.float32)
    b = 0.1 * jax.random.normal(ks[8], (48,), jnp.float32)
    check(x, g, b, 1e-4, force_two_pass=True, row_block=64)

    # 4) bf16 one-pass (MXU row-reduction + bf16 affine path)
    xb = jax.random.normal(ks[9], (4, 16, 256), jnp.float32).astype(jnp.bfloat16)
    gb = 1.0 + 0.1 * jax.random.normal(ks[10], (256,), jnp.float32)
    bb = 0.1 * jax.random.normal(ks[11], (256,), jnp.float32)
    check(xb, gb, bb, 1e-1)

    # 5) bf16 forced two-pass, aligned rows (exercises the MXU stats + combine)
    check(xb, gb, bb, 1e-1, force_two_pass=True, row_block=32)

    print("KERNEL_OK")
</pallas_src>

<mosaic_0001>
module attributes {stable_mosaic.version = 11 : i64} {
  func.func @_seqbn_one_pass_kernel(%arg0: i32, %arg1: memref<16x32xf32, #tpu.memory_space<vmem>>, %arg2: memref<1x32xf32, #tpu.memory_space<vmem>>, %arg3: memref<1x32xf32, #tpu.memory_space<vmem>>, %arg4: memref<16x32xf32, #tpu.memory_space<vmem>>) attributes {dimension_semantics = [#tpu.dimension_semantics<parallel>], iteration_bounds = array<i64: 1>, scalar_prefetch = 0 : i64, scratch_operands = 0 : i64, tpu.core_type = #tpu.core_type<tc>, window_params = [{transform_indices = @transform_0, window_bounds = array<i64: 16, 32>}, {transform_indices = @transform_1, window_bounds = array<i64: 1, 32>}, {transform_indices = @transform_2, window_bounds = array<i64: 1, 32>}, {transform_indices = @transform_3, window_bounds = array<i64: 16, 32>}]} {
    %c0 = arith.constant 0 : index
    %c0_0 = arith.constant 0 : index
    %0 = vector.load %arg1[%c0, %c0_0] : memref<16x32xf32, #tpu.memory_space<vmem>>, vector<16x32xf32>
    %cst = arith.constant dense<0.000000e+00> : vector<32xf32>
    %1 = vector.multi_reduction <add>, %0, %cst [0] : vector<16x32xf32> to vector<32xf32>
    %2 = vector.shape_cast %1 : vector<32xf32> to vector<1x32xf32>
    %cst_1 = arith.constant 6.250000e-02 : f32
    %3 = vector.broadcast %cst_1 : f32 to vector<1x32xf32>
    %4 = arith.mulf %2, %3 : vector<1x32xf32>
    %5 = vector.broadcast %4 : vector<1x32xf32> to vector<16x32xf32>
    %6 = arith.subf %0, %5 : vector<16x32xf32>
    %7 = arith.mulf %6, %6 : vector<16x32xf32>
    %cst_2 = arith.constant dense<0.000000e+00> : vector<32xf32>
    %8 = vector.multi_reduction <add>, %7, %cst_2 [0] : vector<16x32xf32> to vector<32xf32>
    %9 = vector.shape_cast %8 : vector<32xf32> to vector<1x32xf32>
    %cst_3 = arith.constant 6.250000e-02 : f32
    %10 = vector.broadcast %cst_3 : f32 to vector<1x32xf32>
    %11 = arith.mulf %9, %10 : vector<1x32xf32>
    %cst_4 = arith.constant 9.99999974E-6 : f32
    %12 = vector.broadcast %cst_4 : f32 to vector<1x32xf32>
    %13 = arith.addf %11, %12 : vector<1x32xf32>
    %14 = math.rsqrt %13 : vector<1x32xf32>
    %c0_5 = arith.constant 0 : index
    %c0_6 = arith.constant 0 : index
    %15 = vector.load %arg2[%c0_5, %c0_6] : memref<1x32xf32, #tpu.memory_space<vmem>>, vector<1x32xf32>
    %16 = arith.mulf %15, %14 : vector<1x32xf32>
    %c0_7 = arith.constant 0 : index
    %c0_8 = arith.constant 0 : index
    %17 = vector.load %arg3[%c0_7, %c0_8] : memref<1x32xf32, #tpu.memory_space<vmem>>, vector<1x32xf32>
    %18 = arith.mulf %4, %16 : vector<1x32xf32>
    %19 = arith.subf %17, %18 : vector<1x32xf32>
    %20 = vector.broadcast %16 : vector<1x32xf32> to vector<16x32xf32>
    %21 = arith.mulf %0, %20 : vector<16x32xf32>
    %22 = vector.broadcast %19 : vector<1x32xf32> to vector<16x32xf32>
    %23 = arith.addf %21, %22 : vector<16x32xf32>
    %c0_9 = arith.constant 0 : index
    %c0_10 = arith.constant 0 : index
    %24 = vector.load %arg4[%c0_9, %c0_10] : memref<16x32xf32, #tpu.memory_space<vmem>>, vector<16x32xf32>
    tpu.vector_store %arg4[%c0_9, %c0_10], %23 {strides = array<i32>} : memref<16x32xf32, #tpu.memory_space<vmem>>, vector<16x32xf32>,
    return
  }
  func.func @transform_0(%arg0: i32) -> (i32, i32) {
    %c0_i32 = arith.constant 0 : i32
    %c0_i32_0 = arith.constant 0 : i32
    return %c0_i32, %arg0 : i32, i32
  }
  func.func @transform_1(%arg0: i32) -> (i32, i32) {
    %c0_i32 = arith.constant 0 : i32
    %c0_i32_0 = arith.constant 0 : i32
    return %c0_i32, %arg0 : i32, i32
  }
  func.func @transform_2(%arg0: i32) -> (i32, i32) {
    %c0_i32 = arith.constant 0 : i32
    %c0_i32_0 = arith.constant 0 : i32
    return %c0_i32, %arg0 : i32, i32
  }
  func.func @transform_3(%arg0: i32) -> (i32, i32) {
    %c0_i32 = arith.constant 0 : i32
    %c0_i32_0 = arith.constant 0 : i32
    return %c0_i32, %arg0 : i32, i32
  }
}

</mosaic_0001>

<bundles_post_ra>
// kernel: tpu_custom_call.1
= control target key start
LH: loop header
LB: loop body
LE: loop exit
PB: predicated region body
PF: predicated region fallthrough
CT: control target
= control target key end

     0   :  { %8 = vsyncpa [#allocation3], 0  ;;  %s196_s0 = inlined_call_operand.hbm [shape: f32[16,32], index: 0, kind: input, shape index: {}]   ;;  %s197_s1 = inlined_call_operand.vmem [shape: f32[1,32], index: 1, kind: input, shape index: {}]   ;;  %s198_s2 = inlined_call_operand.vmem [shape: f32[1,32], index: 2, kind: input, shape index: {}]   ;;  %s199_s3 = inlined_call_operand.hbm [shape: f32[16,32], index: 3, kind: output, shape index: {}]  }
   0x1   :  { %9 = vsyncpa [#allocation4], 0  ;;  %s148_s12 = smov [#allocation2]  }
   0x2   :  { %s15_s13 = sshll.u32 %s148_s12, 4  ;;  %s16_s13 = int_to_ptr.vmem [resolvable:$true] %s15_s13 }
   0x3   :  { %s112_s14 = scalar_lea.vmem %s16_s13, 256  ;;  %p117_p1 = scmp.lt.s32.totalorder %s16_s13, %s16_s13 }
   0x4   :  { %p113_p0 = scmp.ne.s32.totalorder %s16_s13, %s112_s14  ;;  %p118_p2 = scmp.lt.s32.totalorder %s112_s14, %s112_s14 }
   0x6   :  { %p119_p3 = por %p118_p2, %p117_p1 }
   0x8   :  { %p120_p4 = pnand %p119_p3, %p113_p0 }
   0xa   :  { %123 = shalt.err (!%p120_p4)
}
   0xb   :  { %s149_s15 = smov 128   ;;  %s150_s16 = smov 8  }
   0xc   :  { %21 = dma.hbm_to_vmem [thread:$0]  %s196_s0, 256, %s16_s13, [#allocation3], %s149_s15, %s149_s15, %s150_s16  }
   0xd   :  { %144 = dma.done.wait [#allocation3], 256  }
   0xe   :  { %145 = vsyncadd [#allocation3], 4294967040  ;;  %vm31_vm0 = vcmask 261120   ;;  %v29_v0 = vld [vmem:[#allocation2] sm:$0xff]  ;;  %v30_v1 = vld [vmem:[#allocation2 + $0x8] sm:$0xff]  ;;  %v64_v27 = vlaneseq  ;;  %s151_s22 = smov [#allocation5]  }
   0xf   :  { %v32_v2 = vsel %vm31_vm0, %v29_v0, 0.0  ;;  %v33_v3 = vsel %vm31_vm0, %v30_v1, 0.0  ;;  %v58_v29 = vld [vmem:[%s197_s1] sm:$0x1]  ;;  %s86_s23 = sshll.u32 %s151_s22, 4  ;;  %s87_s23 = int_to_ptr.vmem [resolvable:$true] %s86_s23 }
  0x10   :  { %v34_v4 = vadd.f32 %v33_v3, %v32_v2  ;;  %v65_v28 = vshrl.u32 %v64_v27, 7  ;;  %v60_v33 = vld [vmem:[%s198_s2] sm:$0x1]  ;;  %s124_s1 = scalar_lea.vmem %s87_s23, 256  ;;  %p129_p6 = scmp.lt.s32.totalorder %s87_s23, %s87_s23 }
  0x11   :  { %p125_p5 = scmp.ne.s32.totalorder %s87_s23, %s124_s1  ;;  %p130_p7 = scmp.lt.s32.totalorder %s124_s1, %s124_s1 }
  0x12   :  { %v35_v5 = vrot.slane %v34_v4, 4  ;;  %v66_v30 = vsub.s32 0, %v65_v28 }
  0x13   :  { %p131_p8 = por %p130_p7, %p129_p6 }
  0x14   :  { %v36_v6 = vadd.f32 %v35_v5, %v34_v4 }
  0x15   :  { %p132_p9 = pnand %p131_p8, %p125_p5 }
  0x16   :  { %v37_v7 = vrot.slane %v36_v6, 2 }
  0x18   :  { %v38_v8 = vadd.f32 %v37_v7, %v36_v6 }
  0x1a   :  { %v39_v9 = vrot.slane %v38_v8, 1 }
  0x1c   :  { %v40_v10 = vadd.f32 %v39_v9, %v38_v8 }
  0x1e   :  { %v41_v11 = vmul.f32 0.0625, %v40_v10 }
  0x20   :  { %v42_v12 = vsub.f32 %v29_v0, %v41_v11  ;;  %v43_v13 = vsub.f32 %v30_v1, %v41_v11 }
  0x22   :  { %v44_v14 = vmul.f32 %v42_v12, %v42_v12  ;;  %v45_v15 = vmul.f32 %v43_v13, %v43_v13 }
  0x24   :  { %v46_v16 = vsel %vm31_vm0, %v44_v14, 0.0  ;;  %v47_v17 = vsel %vm31_vm0, %v45_v15, 0.0 }
  0x25   :  { %v48_v18 = vadd.f32 %v47_v17, %v46_v16 }
  0x27   :  { %v49_v19 = vrot.slane %v48_v18, 4 }
  0x29   :  { %v50_v20 = vadd.f32 %v49_v19, %v48_v18 }
  0x2b   :  { %v51_v21 = vrot.slane %v50_v20, 2 }
  0x2d   :  { %v52_v22 = vadd.f32 %v51_v21, %v50_v20 }
  0x2f   :  { %v53_v23 = vrot.slane %v52_v22, 1 }
  0x31   :  { %v54_v24 = vadd.f32 %v53_v23, %v52_v22 }
  0x33   :  { %v55_v25 = vmul.f32 0.0625, %v54_v24 }
  0x35   :  { %v56_v26 = vadd.f32 1e-05, %v55_v25 }
  0x37   :  { %102 = vrsqrt.f32 %v56_v26 }
  0x44   :  { %v103_v31 = vpop.eup %102 }
  0x45   :  { %v59_v32 = vmul.f32 %v103_v31, %v58_v29 }
  0x47   :  { %v61_v34 = vmul.f32 %v59_v32, %v41_v11  ;;  %v67_v35 = vrot.slane %v59_v32, %v66_v30 }
  0x49   :  { %v62_v36 = vsub.f32 %v60_v33, %v61_v34  ;;  %v69_v37 = vmul.f32 %v67_v35, %v29_v0  ;;  %v70_v38 = vmul.f32 %v67_v35, %v30_v1 }
  0x4b   :  { %v75_v39 = vrot.slane %v62_v36, %v66_v30 }
  0x4d   :  { %v77_v40 = vadd.f32 %v75_v39, %v69_v37  ;;  %v78_v41 = vadd.f32 %v75_v39, %v70_v38 }
  0x4f   :  { %79 = vst.msk [vmem:[#allocation5] sm:$0xff] %vm31_vm0, %v77_v40  ;;  %80 = vst.msk [vmem:[#allocation5 + $0x8] sm:$0xff] %vm31_vm0, %v78_v41 }
  0x50   :  { %135 = shalt.err (!%p132_p9)
}
  0x51   :  { %92 = dma.vmem_to_hbm [thread:$0]  %s87_s23, 256, %s199_s3, [#allocation4], %s149_s15, %s149_s15, %s150_s16  }
  0x52   :  { %146 = dma.done.wait [#allocation4], 256  }
  0x53   :  { %147 = vsyncadd [#allocation4], 4294967040 }
  0x54   :  { %96 = vsyncpa [#allocation3], 1 }
  0x55   :  { %97 = vsyncpa [#allocation4], 1 }

</bundles_post_ra>
